<compile_context>
chip_gen: v7x
topology: tpu7x:2x2x1
jax: 0.10.0
libtpu: 0.0.40
codegen_flags: <defaults>
</compile_context>

<pallas_src>
import jax
import jax.numpy as jnp
from jax.experimental import pallas as pl
from jax.experimental.pallas import tpu as pltpu

_MIB = 1024 * 1024


def _round_up(x, m):
    return ((x + m - 1) // m) * m


def _physical_vmem_bytes():
    """Per-core VMEM capacity; conservative (v7x = 64 MiB) fallback."""
    try:
        return int(pltpu.get_tpu_info().vmem_capacity_bytes)
    except Exception:
        return 64 * _MIB


def _vmem_limit_bytes():
    phys = _physical_vmem_bytes()
    # ~60% of physical VMEM: ~38 MiB on v7x (64 MiB), ~76 MiB on v5e/v6e (128 MiB),
    # clipped to [32, 96] MiB so compiler-internal scratch always has headroom.
    return int(min(96 * _MIB, max(32 * _MIB, int(phys * 0.6))))


# ----------------------------------------------------------------------------
# Kernels
# ----------------------------------------------------------------------------
def _linear_resident_kernel(x_ref, wt_ref, b_ref, o_ref):
    # x_ref : (tm, K)   activation tile (full K, streamed once)
    # wt_ref: (K, tn)   VMEM-resident pre-transposed weight block
    # b_ref : (1, tn)   bias block
    # o_ref : (tm, tn)  output tile (lane-dense, unmasked stores)
    o_ref[...] = (
        jnp.dot(
            x_ref[...],
            wt_ref[...],
            preferred_element_type=jnp.float32,
            precision=jax.lax.Precision.HIGHEST,  # true fp32 torch parity
        )
        + b_ref[...]
    ).astype(o_ref.dtype)


def _linear_ktiled_kernel(x_ref, wt_ref, b_ref, o_ref, acc_ref):
    # Fallback for weights too large to keep resident in VMEM.
    k = pl.program_id(2)

    @pl.when(k == 0)
    def _():
        # Seed the accumulator with the broadcast bias: removes the extra
        # (tm, tn) VPU add in the finalize step.
        acc_ref[...] = jnp.broadcast_to(b_ref[...], acc_ref.shape).astype(jnp.float32)

    acc_ref[...] += jnp.dot(
        x_ref[...],
        wt_ref[...],
        preferred_element_type=jnp.float32,
        precision=jax.lax.Precision.HIGHEST,
    )

    @pl.when(k == pl.num_programs(2) - 1)
    def _():
        o_ref[...] = acc_ref[...].astype(o_ref.dtype)


# ----------------------------------------------------------------------------
# Wrapper
# ----------------------------------------------------------------------------
def pallas_linear(x_flat, wt_full, b_padded, out_features):
    """y = x_flat @ W^T + b (torch.nn.Linear semantics).

    `wt_full`  : (K, N_p) weight already transposed at init, zero-padded in N
                 to a 128-multiple; K is left unpadded (full-dim blocks).
    `b_padded` : (1, N_p) zero-padded bias.
    """
    B, K = x_flat.shape
    K_w, N_p = wt_full.shape
    assert K_w == K, "weight / activation inner-dim mismatch"

    itemsize = 4  # fp32
    vmem_limit = _vmem_limit_bytes()

    # ---- M tiling -----------------------------------------------------------
    # Small batches: a single full-dim M block (legal for any B, needs no pad).
    # Large batches: 256-row MXU-sized tiles, batch padded UP to the tile.
    if B <= 256:
        tm, M_p = B, B
    else:
        tm = 256
        M_p = _round_up(B, tm)
    m_blocks = M_p // tm

    # ---- N tiling (N_p is a 128-multiple by construction) -------------------
    if m_blocks > 1:
        # Full-N block => the weight block index is constant across the whole
        # grid, so the weight is DMA'd exactly once (never re-streamed per i).
        tn = N_p
    else:
        # Single M block: split N when possible so v7x's two TensorCores both
        # get work; each weight tile is still fetched exactly once (i == 0).
        tn = next((t for t in (512, 256, 128) if N_p % t == 0 and t < N_p), N_p)
    n_blocks = N_p // tn

    # ---- Resident-weight vs K-tiled decision (double-buffered streams) ------
    resident_bytes = itemsize * 2 * (tm * K + K * tn + tm * tn + tn)
    use_resident = resident_bytes <= int(0.8 * vmem_limit)

    if use_resident:
        x_in = jnp.pad(x_flat, ((0, M_p - B), (0, 0))) if M_p != B else x_flat
        cost = pl.CostEstimate(
            flops=2 * M_p * K * N_p,
            transcendentals=0,
            # Under these index maps every operand is streamed exactly once.
            bytes_accessed=itemsize * (M_p * K + K * N_p + N_p + M_p * N_p),
        )
        out_p = pl.pallas_call(
            _linear_resident_kernel,
            out_shape=jax.ShapeDtypeStruct((M_p, N_p), x_flat.dtype),
            grid_spec=pltpu.PrefetchScalarGridSpec(
                num_scalar_prefetch=0,
                grid=(m_blocks, n_blocks),
                in_specs=[
                    pl.BlockSpec((tm, K), lambda i, j: (i, 0)),
                    pl.BlockSpec((K, tn), lambda i, j: (0, j)),
                    pl.BlockSpec((1, tn), lambda i, j: (0, j)),
                ],
                out_specs=pl.BlockSpec((tm, tn), lambda i, j: (i, j)),
            ),
            compiler_params=pltpu.CompilerParams(
                dimension_semantics=("parallel", "parallel"),
                vmem_limit_bytes=vmem_limit,
            ),
            cost_estimate=cost,
        )(x_in, wt_full, b_padded)
        return out_p[:B, :out_features]

    # ---- K-tiled fallback (very large weights only) --------------------------
    # Production use at this size would pre-pad W in K at init; here we pad per
    # call since this path only triggers for weights that don't fit VMEM.
    tk = 512
    K_p = _round_up(K, tk)
    tn = next((t for t in (512, 256, 128) if N_p % t == 0), N_p)
    n_blocks = N_p // tn
    wt_in = jnp.pad(wt_full, ((0, K_p - K), (0, 0))) if K_p != K else wt_full
    x_in = (
        jnp.pad(x_flat, ((0, M_p - B), (0, K_p - K)))
        if (M_p, K_p) != (B, K)
        else x_flat
    )
    cost = pl.CostEstimate(
        flops=2 * M_p * K_p * N_p,
        transcendentals=0,
        # x is re-streamed per N block and W per M block under these maps.
        bytes_accessed=itemsize
        * (n_blocks * M_p * K_p + m_blocks * K_p * N_p + N_p + M_p * N_p),
    )
    out_p = pl.pallas_call(
        _linear_ktiled_kernel,
        out_shape=jax.ShapeDtypeStruct((M_p, N_p), x_flat.dtype),
        grid_spec=pltpu.PrefetchScalarGridSpec(
            num_scalar_prefetch=0,
            grid=(m_blocks, n_blocks, K_p // tk),
            in_specs=[
                pl.BlockSpec((tm, tk), lambda i, j, k: (i, k)),
                pl.BlockSpec((tk, tn), lambda i, j, k: (k, j)),
                pl.BlockSpec((1, tn), lambda i, j, k: (0, j)),
            ],
            out_specs=pl.BlockSpec((tm, tn), lambda i, j, k: (i, j)),
            scratch_shapes=[pltpu.VMEM((tm, tn), jnp.float32)],
        ),
        compiler_params=pltpu.CompilerParams(
            dimension_semantics=("parallel", "parallel", "arbitrary"),
            vmem_limit_bytes=vmem_limit,
        ),
        cost_estimate=cost,
    )(x_in, wt_in, b_padded)
    return out_p[:B, :out_features]


# ----------------------------------------------------------------------------
# Module port
# ----------------------------------------------------------------------------
class LinearModel:
    """JAX/Pallas port of the PyTorch `Linear` module."""

    def __init__(self, past_window, in_units, future_window, out_units, key):
        self.past_window = past_window
        self.in_units = in_units
        self.future_window = future_window
        self.out_units = out_units
        self.input_size = int(past_window * in_units)      # K
        self.output_size = int(future_window * out_units)  # N

        # Deterministic init mimicking torch.nn.Linear's U(-1/sqrt(fan_in), +).
        kw, kb = jax.random.split(key)
        bound = 1.0 / (self.input_size ** 0.5)
        self.weight = jax.random.uniform(
            kw, (self.output_size, self.input_size), jnp.float32, -bound, bound
        )
        self.bias = jax.random.uniform(
            kb, (self.output_size,), jnp.float32, -bound, bound
        )

        # One-time layout prep: transpose W to [K, N] and zero-pad N to a
        # 128-multiple (lane-dense, unmasked stores). K stays unpadded — the
        # kernel uses full-dim K blocks, so no per-call K padding ever happens.
        N_p = _round_up(self.output_size, 128)
        self.weight_t_padded = (
            jnp.zeros((self.input_size, N_p), jnp.float32)
            .at[:, : self.output_size]
            .set(self.weight.T)
        )
        self.bias_padded = (
            jnp.zeros((1, N_p), jnp.float32)
            .at[0, : self.output_size]
            .set(self.bias)
        )

    def __call__(self, x):
        # x: [Batch, seq_len(=past_window), in_units]
        batch_size = x.shape[0]
        x_flat = x.reshape(batch_size, -1)  # flatten(1)
        out = pallas_linear(
            x_flat, self.weight_t_padded, self.bias_padded, self.output_size
        )
        return out.reshape(batch_size, self.future_window, -1)


if __name__ == "__main__":
    # Small shapes consistent with the module's forward semantics.
    batch = 2
    past_window = 8
    in_units = 4
    future_window = 4
    out_units = 8

    key = jax.random.PRNGKey(0)
    k_model, k_x = jax.random.split(key)

    model = LinearModel(past_window, in_units, future_window, out_units, k_model)

    x = jax.random.normal(k_x, (batch, past_window, in_units), jnp.float32)

    out = model(x)
    out = jax.block_until_ready(out)

    # Reference check in plain JAX (same math as torch.nn.Linear, fp32).
    ref = (
        x.reshape(batch, -1) @ model.weight.T + model.bias
    ).reshape(batch, future_window, -1)
    assert out.shape == (batch, future_window, out_units)
    assert jnp.allclose(out, ref, atol=1e-5, rtol=1e-5)

    print("KERNEL_OK")
</pallas_src>

<mosaic_0001>
module attributes {stable_mosaic.version = 11 : i64} {
  func.func @_linear_resident_kernel(%arg0: i32, %arg1: i32, %arg2: memref<2x32xf32, #tpu.memory_space<vmem>>, %arg3: memref<32x128xf32, #tpu.memory_space<vmem>>, %arg4: memref<1x128xf32, #tpu.memory_space<vmem>>, %arg5: memref<2x128xf32, #tpu.memory_space<vmem>>) attributes {dimension_semantics = [#tpu.dimension_semantics<parallel>, #tpu.dimension_semantics<parallel>], iteration_bounds = array<i64: 1, 1>, scalar_prefetch = 0 : i64, scratch_operands = 0 : i64, tpu.core_type = #tpu.core_type<tc>, window_params = [{transform_indices = @transform_0, window_bounds = array<i64: 2, 32>}, {transform_indices = @transform_1, window_bounds = array<i64: 32, 128>}, {transform_indices = @transform_2, window_bounds = array<i64: 1, 128>}, {transform_indices = @transform_3, window_bounds = array<i64: 2, 128>}]} {
    %c0 = arith.constant 0 : index
    %c0_0 = arith.constant 0 : index
    %0 = vector.load %arg2[%c0, %c0_0] : memref<2x32xf32, #tpu.memory_space<vmem>>, vector<2x32xf32>
    %c0_1 = arith.constant 0 : index
    %c0_2 = arith.constant 0 : index
    %1 = vector.load %arg3[%c0_1, %c0_2] : memref<32x128xf32, #tpu.memory_space<vmem>>, vector<32x128xf32>
    %cst = arith.constant dense<0.000000e+00> : vector<2x128xf32>
    %2 = tpu.matmul %0, %1, %cst {dimension_numbers = #tpu.dot_dimension_numbers<[1], [0], [0], [1], [0, 0, 1, 1], [], []>, precision = #tpu.contract_precision<fp32>} : vector<2x32xf32>, vector<32x128xf32>, vector<2x128xf32> -> vector<2x128xf32>
    %c0_3 = arith.constant 0 : index
    %c0_4 = arith.constant 0 : index
    %3 = vector.load %arg4[%c0_3, %c0_4] : memref<1x128xf32, #tpu.memory_space<vmem>>, vector<1x128xf32>
    %4 = vector.broadcast %3 : vector<1x128xf32> to vector<2x128xf32>
    %5 = arith.addf %2, %4 : vector<2x128xf32>
    %c0_5 = arith.constant 0 : index
    %c0_6 = arith.constant 0 : index
    %6 = vector.load %arg5[%c0_5, %c0_6] : memref<2x128xf32, #tpu.memory_space<vmem>>, vector<2x128xf32>
    tpu.vector_store %arg5[%c0_5, %c0_6], %5 {strides = array<i32>} : memref<2x128xf32, #tpu.memory_space<vmem>>, vector<2x128xf32>,
    return
  }
  func.func @transform_0(%arg0: i32, %arg1: i32) -> (i32, i32) {
    %c0_i32 = arith.constant 0 : i32
    %c0_i32_0 = arith.constant 0 : i32
    return %arg0, %c0_i32 : i32, i32
  }
  func.func @transform_1(%arg0: i32, %arg1: i32) -> (i32, i32) {
    %c0_i32 = arith.constant 0 : i32
    %c0_i32_0 = arith.constant 0 : i32
    return %c0_i32, %arg1 : i32, i32
  }
  func.func @transform_2(%arg0: i32, %arg1: i32) -> (i32, i32) {
    %c0_i32 = arith.constant 0 : i32
    %c0_i32_0 = arith.constant 0 : i32
    return %c0_i32, %arg1 : i32, i32
  }
  func.func @transform_3(%arg0: i32, %arg1: i32) -> (i32, i32) {
    %c0_i32 = arith.constant 0 : i32
    return %arg0, %arg1 : i32, i32
  }
}

</mosaic_0001>

<bundles_post_ra>
// kernel: tpu_custom_call.1
= control target key start
LH: loop header
LB: loop body
LE: loop exit
PB: predicated region body
PF: predicated region fallthrough
CT: control target
= control target key end

     0   :  { %8 = vsyncpa [#allocation3], 0  ;;  %s880_s0 = inlined_call_operand.hbm [shape: f32[2,32], index: 0, kind: input, shape index: {}]   ;;  %s881_s1 = inlined_call_operand.hbm [shape: f32[32,128], index: 1, kind: input, shape index: {}]   ;;  %s882_s2 = inlined_call_operand.vmem [shape: f32[1,128], index: 2, kind: input, shape index: {}]   ;;  %s883_s3 = inlined_call_operand.hbm [shape: f32[2,128], index: 3, kind: output, shape index: {}]  }
   0x1   :  { %9 = vsyncpa [#allocation6], 0 }
   0x2   :  { %10 = vsyncpa [#allocation4], 0  ;;  %s782_s12 = smov [#allocation2]   ;;  %s783_s14 = smov [#allocation5]  }
   0x3   :  { %s17_s13 = sshll.u32 %s782_s12, 4  ;;  %s26_s15 = sshll.u32 %s783_s14, 4  ;;  %s18_s13 = int_to_ptr.vmem [resolvable:$true] %s17_s13  ;;  %s810_s15 = int_to_ptr.vmem [resolvable:$true] %s26_s15 }
   0x4   :  { %s710_s18 = scalar_lea.hbm %s880_s0, 32 }
   0x5   :  { %p711_p0 = scmp.ne.s32.totalorder %s880_s0, %s710_s18  ;;  %p714_p1 = scmp.lt.u32.totalorder %s710_s18, %s880_s0 }
   0x7   :  { %p716_p2 = pnand %p714_p1, %p711_p0 }
   0x9   :  { %719 = shalt.err (!%p716_p2)
}
   0xa   :  { %s720_s23 = scalar_lea.vmem %s18_s13, 32  ;;  %p725_p4 = scmp.lt.s32.totalorder %s18_s13, %s18_s13 }
   0xb   :  { %p721_p3 = scmp.ne.s32.totalorder %s18_s13, %s720_s23  ;;  %p726_p5 = scmp.lt.s32.totalorder %s720_s23, %s720_s23 }
   0xd   :  { %p727_p6 = por %p726_p5, %p725_p4 }
   0xf   :  { %p728_p7 = pnand %p727_p6, %p721_p3 }
  0x11   :  { %731 = shalt.err (!%p728_p7)
}
  0x12   :  { %20 = dma.hbm_to_vmem [thread:$0]  %s880_s0, 32, %s18_s13, [#allocation3]  }
  0x13   :  { %s732_s28 = scalar_lea.hbm %s881_s1, 512 }
  0x14   :  { %p733_p8 = scmp.ne.s32.totalorder %s881_s1, %s732_s28  ;;  %p736_p9 = scmp.lt.u32.totalorder %s732_s28, %s881_s1 }
  0x16   :  { %p738_p10 = pnand %p736_p9, %p733_p8 }
  0x18   :  { %741 = shalt.err (!%p738_p10)
}
  0x19   :  { %s742_s6 = scalar_lea.vmem %s810_s15, 512  ;;  %p747_p12 = scmp.lt.s32.totalorder %s810_s15, %s810_s15 }
  0x1a   :  { %p743_p11 = scmp.ne.s32.totalorder %s810_s15, %s742_s6  ;;  %p748_p13 = scmp.lt.s32.totalorder %s742_s6, %s742_s6 }
  0x1c   :  { %p749_p0 = por %p748_p13, %p747_p12 }
  0x1e   :  { %p750_p1 = pnand %p749_p0, %p743_p11 }
  0x20   :  { %753 = shalt.err (!%p750_p1)
}
  0x21   :  { %s784_s0 = smov 128   ;;  %s785_s7 = smov 8  }
  0x22   :  { %32 = dma.hbm_to_vmem [thread:$0]  %s881_s1, 512, %s810_s15, [#allocation6], %s784_s0, %s784_s0, %s785_s7  }
  0x23   :  { %776 = dma.done.wait [#allocation3], 32  }
  0x24   :  { %777 = vsyncadd [#allocation3], 4294967264 }
  0x25   :  { %778 = dma.done.wait [#allocation6], 512  }
  0x26   :  { %779 = vsyncadd [#allocation6], 4294966784  ;;  %v786_v0 = vmov 0.0|0.0   ;;  %vm787_vm0 = vmmov 0   ;;  %v788_v1 = vmov 0.0   ;;  %vm53_vm1 = vcmask 261120  }
  0x27   :  { %656 = vmatprep.subr.bf16.mxu1 %v786_v0  ;;  %674 = vmatprep.subr.bf16.mxu0 %v786_v0  ;;  %v42_v2 = vld [vmem:[#allocation5] sm:$0xff]  ;;  %v43_v3 = vld [vmem:[#allocation5 + $0x8] sm:$0xff]  ;;  %v44_v4 = vld [vmem:[#allocation5 + $0x10] sm:$0xff]  ;;  %s789_s11 = smov [#allocation7]  }
  0x28   :  { %598 = vmatprep.mubr.msk.f32.mxu1 %vm787_vm0, %v788_v1  ;;  %631 = vmatprep.mubr.msk.f32.mxu0 %vm787_vm0, %v788_v1  ;;  %v58_v5 = vand.u32 4294901760, %v42_v2  ;;  %v61_v6 = vand.u32 4294901760, %v43_v3  ;;  %v45_v7 = vld [vmem:[#allocation5 + $0x18] sm:$0xff]  ;;  %v64_v8 = vand.u32 4294901760, %v44_v4  ;;  %s549_s12 = sshll.u32 %s789_s11, 4  ;;  %s550_s12 = int_to_ptr.vmem [resolvable:$true] %s549_s12 }
  0x29   :  { %v41_v9 = vld [vmem:[#allocation2] sm:$0x3]  ;;  %v67_v10 = vand.u32 4294901760, %v45_v7  ;;  %s754_s13 = scalar_lea.vmem %s550_s12, 32  ;;  %p759_p3 = scmp.lt.s32.totalorder %s550_s12, %s550_s12 }
  0x2a   :  { %v55_v11 = vsel %vm53_vm1, %v41_v9, 0  ;;  %v657_v12 = vpack.c.bf16 %v61_v6, %v58_v5  ;;  %v138_v13 = vsub.f32 %v42_v2, %v58_v5  ;;  %v145_v14 = vsub.f32 %v43_v3, %v61_v6  ;;  %v559_v41 = vld [vmem:[%s882_s2] ss:$0 sm:$0xff]  ;;  %p755_p2 = scmp.ne.s32.totalorder %s550_s12, %s754_s13  ;;  %p760_p4 = scmp.lt.s32.totalorder %s754_s13, %s754_s13 }
  0x2b   :  { %v152_v15 = vsub.f32 %v44_v4, %v64_v8  ;;  %v159_v16 = vsub.f32 %v45_v7, %v67_v10  ;;  %v126_v17 = vand.u32 4294901760, %v55_v11  ;;  %v660_v18 = vpack.c.bf16 %v67_v10, %v64_v8 }
  0x2c   :  { %658 = vmatpush3.bf16.msra.mxu1 %v657_v12  ;;  %676 = vmatpush3.bf16.msra.mxu0 %v657_v12  ;;  %v139_v19 = vand.u32 4294901760, %v138_v13  ;;  %v146_v20 = vand.u32 4294901760, %v145_v14  ;;  %v669_v39 = vpack.c.bf16 %v145_v14, %v138_v13  ;;  %p761_p5 = por %p760_p4, %p759_p3 }
  0x2d   :  { %v153_v21 = vand.u32 4294901760, %v152_v15  ;;  %659 = vmatprep.subr.bf16.mxu1 %v786_v0  ;;  %677 = vmatprep.subr.bf16.mxu0 %v786_v0  ;;  %v127_v22 = vsub.f32 %v55_v11, %v126_v17  ;;  %v160_v23 = vand.u32 4294901760, %v159_v16  ;;  %v672_v40 = vpack.c.bf16 %v159_v16, %v152_v15 }
  0x2e   :  { %v140_v24 = vsub.f32 %v138_v13, %v139_v19  ;;  %v147_v25 = vsub.f32 %v145_v14, %v146_v20  ;;  %v681_v31 = vpack.c.bf16 %v146_v20, %v139_v19  ;;  %p762_p6 = pnand %p761_p5, %p755_p2 }
  0x2f   :  { %v154_v26 = vsub.f32 %v152_v15, %v153_v21  ;;  %v128_v27 = vand.u32 4294901760, %v127_v22  ;;  %v161_v28 = vsub.f32 %v159_v16, %v160_v23  ;;  %v684_v37 = vpack.c.bf16 %v160_v23, %v153_v21 }
  0x30   :  { %661 = vmatpush3.bf16.msra.mxu1 %v660_v18  ;;  %679 = vmatpush3.bf16.msra.mxu0 %v660_v18  ;;  %v141_v29 = vand.u32 4294901760, %v140_v24  ;;  %v148_v30 = vand.u32 4294901760, %v147_v25 }
  0x31   :  { %v129_v32 = vsub.f32 %v127_v22, %v128_v27  ;;  %662 = vmatprep.subr.bf16.mxu1 %v786_v0  ;;  %680 = vmatprep.subr.bf16.mxu0 %v786_v0  ;;  %v155_v34 = vand.u32 4294901760, %v154_v26  ;;  %v162_v35 = vand.u32 4294901760, %v161_v28 }
  0x32   :  { %v663_v33 = vpack.c.bf16 %v148_v30, %v141_v29 }
  0x33   :  { %v130_v36 = vand.u32 4294901760, %v129_v32  ;;  %632 = vmatmul.mubr.f32.vlgmr.msra.gmra.mrb[0].mxu0 %v128_v27  ;;  %v666_v38 = vpack.c.bf16 %v162_v35, %v155_v34 }
  0x34   :  { %682 = vmatpush3.bf16.msra.mxu0 %v681_v31  ;;  %642 = vmatprep.mubr.msk.f32.mxu0 %vm787_vm0, %v788_v1 }
  0x35   :  { %599 = vmatmul.mubr.f32.vlgmr.msra.gmra.mrb[0].mxu1 %v130_v36  ;;  %683 = vmatprep.subr.bf16.mxu0 %v786_v0 }
  0x36   :  { %664 = vmatpush3.bf16.msra.mxu1 %v663_v33  ;;  %609 = vmatprep.mubr.msk.f32.mxu1 %vm787_vm0, %v788_v1 }
  0x37   :  { %665 = vmatprep.subr.bf16.mxu1 %v786_v0 }
  0x38   :  { %685 = vmatpush3.bf16.msra.mxu0 %v684_v37 }
  0x39   :  { %686 = vmatprep.subr.bf16.mxu0 %v786_v0 }
  0x3a   :  { %667 = vmatpush3.bf16.msra.mxu1 %v666_v38 }
  0x3b   :  { %668 = vmatprep.subr.bf16.mxu1 %v786_v0  ;;  %643 = vmatmul.mubr.f32.vlgmr.msra.gmra.mrb[0].mxu0 %v126_v17 }
  0x3c   :  { %688 = vmatpush3.bf16.msra.mxu0 %v657_v12  ;;  %653 = vmatprep.mubr.msk.f32.mxu0 %vm787_vm0, %v788_v1 }
  0x3d   :  { %610 = vmatmul.mubr.f32.vlgmr.msra.gmra.mrb[0].mxu1 %v126_v17  ;;  %689 = vmatprep.subr.bf16.mxu0 %v786_v0 }
  0x3e   :  { %670 = vmatpush3.bf16.msra.mxu1 %v669_v39  ;;  %620 = vmatprep.mubr.msk.f32.mxu1 %vm787_vm0, %v788_v1 }
  0x3f   :  { %671 = vmatprep.subr.bf16.mxu1 %v786_v0 }
  0x40   :  { %691 = vmatpush3.bf16.msra.mxu0 %v660_v18 }
  0x42   :  { %673 = vmatpush3.bf16.msra.mxu1 %v672_v40 }
  0x43   :  { %654 = vmatmul.mubr.f32.vlgmr.msra.gmra.mrb[0].mxu0 %v126_v17 }
  0x45   :  { %621 = vmatmul.mubr.f32.vlgmr.msra.gmra.mrb[0].mxu1 %v127_v22 }
 0x116   :  { %v538_v42 = vpop.f32.mrb[0].mxu0 }
 0x117   :  { %v655_v43 = vpop.f32.mrb[1].mxu0 }
 0x118   :  { %v303_v44 = vpop.f32.mrb[0].mxu1 }
 0x119   :  { %v692_v45 = vadd.f32 %v559_v41, %v303_v44  ;;  %v622_v46 = vpop.f32.mrb[1].mxu1 }
 0x11b   :  { %v693_v47 = vadd.f32 %v692_v45, %v538_v42 }
 0x11d   :  { %542 = vst [vmem:[#allocation7] sm:$0x3] %v693_v47 }
 0x11e   :  { %765 = shalt.err (!%p762_p6)
}
 0x11f   :  { %s766_s2 = scalar_lea.hbm %s883_s3, 32 }
 0x120   :  { %p767_p7 = scmp.ne.s32.totalorder %s883_s3, %s766_s2  ;;  %p770_p8 = scmp.lt.u32.totalorder %s766_s2, %s883_s3 }
 0x122   :  { %p772_p9 = pnand %p770_p8, %p767_p7 }
 0x124   :  { %775 = shalt.err (!%p772_p9)
}
 0x125   :  { %552 = dma.vmem_to_hbm [thread:$0]  %s550_s12, 32, %s883_s3, [#allocation4]  }
 0x126   :  { %780 = dma.done.wait [#allocation4], 32  }
 0x127   :  { %781 = vsyncadd [#allocation4], 4294967264 }
 0x128   :  { %556 = vsyncpa [#allocation3], 1 }
 0x129   :  { %557 = vsyncpa [#allocation6], 1 }
 0x12a   :  { %558 = vsyncpa [#allocation4], 1 }

</bundles_post_ra>
